<compile_context>
chip_gen: v7x
topology: tpu7x:2x2x1
jax: 0.10.0
libtpu: 0.0.40
codegen_flags: <defaults>
</compile_context>

<pallas_src>
import jax
import jax.numpy as jnp
from jax import lax
from jax.experimental import pallas as pl
from jax.experimental.pallas import tpu as pltpu

# TODO(synk): convnext_tiny backbone trunk (conv stages, pretrained weights) is
# not re-implemented; the kernel starts from the backbone's final feature map.

LN_EPS = 1e-6


def model_progression_kernel(x_ref, gamma_ref, beta_ref, w_ref, b_ref, out_ref):
    """Fused global-avg-pool + LayerNorm + Linear.

    x_ref:     [TB, HW, F]   backbone feature map tile, channels-last (bf16)
    gamma_ref: [1, F]        LayerNorm weight (f32)
    beta_ref:  [1, F]        LayerNorm bias   (f32)
    w_ref:     [F, OPAD]     Linear weight, transposed + lane-padded (bf16)
    b_ref:     [1, OPAD]     Linear bias, lane-padded (f32)
    out_ref:   [TB, OPAD]    (f32)
    """
    hw = x_ref.shape[1]

    # --- adaptive_avg_pool2d(1,1) + view(B, -1): fused bf16->f32 convert-reduce
    # over the sublane (HW) axis; F stays on lanes (no full f32 tile copy). ---
    feat = jnp.sum(x_ref[...], axis=1, dtype=jnp.float32) * (1.0 / hw)    # [TB, F]

    # --- nn.LayerNorm(feat_size, eps=1e-6, elementwise_affine=True): lane reduce ---
    mu = jnp.mean(feat, axis=-1, keepdims=True)                           # [TB, 1]
    var = jnp.mean(jnp.square(feat - mu), axis=-1, keepdims=True)
    norm = (feat - mu) * lax.rsqrt(var + LN_EPS)                          # [TB, F]
    y = norm * gamma_ref[...] + beta_ref[...]                             # broadcast [1, F]

    # --- nn.Flatten is a no-op on [TB, F]; nn.Linear(feat_size, output_size).
    # bf16 operands on the MXU, f32 accumulation; bias added in f32. ---
    out = jnp.dot(y.astype(w_ref.dtype), w_ref[...],
                  preferred_element_type=jnp.float32) + b_ref[...]
    out_ref[...] = out.astype(out_ref.dtype)                              # lane-dense store


def _round_up(n, m):
    return ((n + m - 1) // m) * m


def _vmem_limit_bytes():
    """Per-generation scoped-VMEM request (v5e/v6e: 64 MiB of 128 MiB physical;
    v7x: 32 MiB of 64 MiB physical)."""
    phys = None
    try:
        phys = getattr(pltpu.get_tpu_info(), "vmem_capacity_bytes", None)
    except Exception:
        phys = None
    if not phys:
        phys = 64 * 1024 * 1024                     # conservative fallback (v7x physical)
    return int(min(phys // 2, 64 * 1024 * 1024))


def _pick_batch_tile(B, row_bytes, x_budget):
    """Largest multiple-of-8 batch tile that (a) fits the x VMEM budget and
    (b) leaves >= 2 grid steps (>= 4 for larger batches) so double-buffering
    overlaps DMA/compute and v7x can shard the parallel batch axis across
    both TensorCores."""
    if B <= 8:
        return B                                    # single tiny tile; grid=(1,)
    min_steps = 4 if B >= 32 else 2
    tb = min(B, max(1, x_budget // row_bytes), max(1, B // min_steps))
    tb = max(8, (tb // 8) * 8)                      # sublane-friendly
    return tb


def model_progression_forward(x, gamma, beta, w, b, *, batch_tile=None,
                              data_format="NHWC"):
    """Backbone feature map -> avgpool -> LayerNorm -> Linear.  Returns [B, O] f32.

    x: [B, H, W, F] (NHWC, preferred: feeds the kernel with zero relayout) or
       [B, F, H, W] (NCHW: costs an extra XLA transpose / HBM round trip of x).
    """
    if data_format == "NHWC":
        B, H, W, F = x.shape
        x_cl = x.reshape(B, H * W, F)               # free reshape, no relayout
    elif data_format == "NCHW":
        # TODO(synk): prefer an NHWC producer; this relayout doubles x's HBM traffic.
        B, F, H, W = x.shape
        x_cl = jnp.transpose(x.reshape(B, F, H * W), (0, 2, 1))
    else:
        raise ValueError(f"unknown data_format {data_format!r}")
    HW = H * W
    O = w.shape[1]
    OPAD = _round_up(O, 128)                        # lane-dense output / MXU N dim

    gamma2 = gamma.reshape(1, F).astype(jnp.float32)
    beta2 = beta.reshape(1, F).astype(jnp.float32)
    # bf16 MXU operands (f32 accumulate); bias stays f32 for the epilogue add.
    w_pad = jnp.zeros((F, OPAD), jnp.bfloat16).at[:, :O].set(w.astype(jnp.bfloat16))
    b_pad = jnp.zeros((1, OPAD), jnp.float32).at[0, :O].set(b.astype(jnp.float32))

    vmem_limit = _vmem_limit_bytes()
    x_itemsize = x_cl.dtype.itemsize
    # Per batch-row VMEM: double-buffered x tile + (conservatively) one f32
    # accumulation copy of the tile + double-buffered f32 output row.
    row_bytes = HW * F * (2 * x_itemsize + 4) + 2 * OPAD * 4
    resident_bytes = F * OPAD * 2 + 2 * F * 4 + OPAD * 4        # w / gamma / beta / bias
    x_budget = max(row_bytes, int(0.6 * vmem_limit) - resident_bytes)

    TB = batch_tile if batch_tile is not None else _pick_batch_tile(B, row_bytes, x_budget)
    steps = pl.cdiv(B, TB)
    Bpad = steps * TB
    if Bpad != B:                                   # awkward batch: pad, slice afterwards
        x_cl = jnp.pad(x_cl, ((0, Bpad - B), (0, 0), (0, 0)))

    resident = dict(pipeline_mode=pl.Buffered(1))   # params stay put across grid steps
    cost = pl.CostEstimate(
        flops=int(Bpad * HW * F + 8 * Bpad * F + 2 * Bpad * F * OPAD),
        transcendentals=int(Bpad),
        bytes_accessed=int(Bpad * HW * F * x_itemsize + F * OPAD * 2
                           + 2 * F * 4 + OPAD * 4 + Bpad * OPAD * 4),
    )

    out_pad = pl.pallas_call(
        model_progression_kernel,
        out_shape=jax.ShapeDtypeStruct((Bpad, OPAD), jnp.float32),
        grid=(steps,),
        in_specs=[
            pl.BlockSpec((TB, HW, F), lambda i: (i, 0, 0)),          # streamed x tiles
            pl.BlockSpec((1, F), lambda i: (0, 0), **resident),
            pl.BlockSpec((1, F), lambda i: (0, 0), **resident),
            pl.BlockSpec((F, OPAD), lambda i: (0, 0), **resident),
            pl.BlockSpec((1, OPAD), lambda i: (0, 0), **resident),
        ],
        out_specs=pl.BlockSpec((TB, OPAD), lambda i: (i, 0)),
        compiler_params=pltpu.CompilerParams(
            dimension_semantics=("parallel",),      # megacore-shard batch on v7x
            vmem_limit_bytes=vmem_limit,            # explicit per-generation budget
        ),
        cost_estimate=cost,
    )(x_cl, gamma2, beta2, w_pad, b_pad)

    return out_pad[:B, :O]


def _reference_forward(x, gamma, beta, w, b, data_format="NHWC"):
    """Pure-JAX reference mirroring the PyTorch semantics."""
    xf = x.astype(jnp.float32)
    if data_format == "NHWC":
        feat = jnp.mean(xf, axis=(1, 2))                            # avgpool + view
    else:
        feat = jnp.mean(xf, axis=(2, 3))
    mu = jnp.mean(feat, axis=-1, keepdims=True)
    var = jnp.mean((feat - mu) ** 2, axis=-1, keepdims=True)
    y = (feat - mu) / jnp.sqrt(var + LN_EPS) * gamma + beta         # LayerNorm
    return y @ w.astype(jnp.float32) + b                            # Linear


if __name__ == "__main__":
    # Small shapes consistent with the module's forward:
    #   backbone feature map [B, H, W, feat_size] (channels-last), output_size=20.
    B, H, W, FEAT = 16, 8, 8, 32
    OUT = 20

    key = jax.random.PRNGKey(0)
    kx, kw, kb = jax.random.split(key, 3)

    # Feature map produced channels-last (NHWC) so nothing re-layouts x before
    # the kernel; bf16 halves the dominant HBM stream.
    x = jax.random.normal(kx, (B, H, W, FEAT), jnp.float32).astype(jnp.bfloat16)

    # nn.LayerNorm default init: gamma=1, beta=0; nn.Linear: uniform +-1/sqrt(fan_in).
    gamma = jnp.ones((FEAT,), dtype=jnp.float32)
    beta = jnp.zeros((FEAT,), dtype=jnp.float32)
    bound = 1.0 / (FEAT ** 0.5)
    w = jax.random.uniform(kw, (FEAT, OUT), jnp.float32, -bound, bound)
    b = jax.random.uniform(kb, (OUT,), jnp.float32, -bound, bound)

    # Auto tile picker -> TB=8, grid=(2,): exercises batch tiling + pipelining.
    out = model_progression_forward(x, gamma, beta, w, b, data_format="NHWC")
    out = jax.block_until_ready(out)

    ref = _reference_forward(x, gamma, beta, w, b, data_format="NHWC")
    assert out.shape == (B, OUT), out.shape
    # bf16 feature map + bf16 MXU operands are an intentional precision trade
    # vs. the f32 PyTorch model; f32 accumulation keeps error at ~1e-3 level.
    assert jnp.allclose(out, ref, atol=1e-2, rtol=1e-2), "mismatch vs reference"

    print("KERNEL_OK")
</pallas_src>

<mosaic_0001>
module attributes {stable_mosaic.version = 11 : i64} {
  func.func @model_progression_kernel(%arg0: i32, %arg1: memref<8x64x32xbf16, #tpu.memory_space<vmem>>, %arg2: memref<1x32xf32, #tpu.memory_space<vmem>>, %arg3: memref<1x32xf32, #tpu.memory_space<vmem>>, %arg4: memref<32x128xbf16, #tpu.memory_space<vmem>>, %arg5: memref<1x128xf32, #tpu.memory_space<vmem>>, %arg6: memref<8x128xf32, #tpu.memory_space<vmem>>) attributes {dimension_semantics = [#tpu.dimension_semantics<parallel>], iteration_bounds = array<i64: 2>, scalar_prefetch = 0 : i64, scratch_operands = 0 : i64, tpu.core_type = #tpu.core_type<tc>, window_params = [{transform_indices = @transform_0, window_bounds = array<i64: 8, 64, 32>}, {pipeline_mode = #tpu.pipeline_mode<synchronous>, transform_indices = @transform_1, window_bounds = array<i64: 1, 32>}, {pipeline_mode = #tpu.pipeline_mode<synchronous>, transform_indices = @transform_2, window_bounds = array<i64: 1, 32>}, {pipeline_mode = #tpu.pipeline_mode<synchronous>, transform_indices = @transform_3, window_bounds = array<i64: 32, 128>}, {pipeline_mode = #tpu.pipeline_mode<synchronous>, transform_indices = @transform_4, window_bounds = array<i64: 1, 128>}, {transform_indices = @transform_5, window_bounds = array<i64: 8, 128>}]} {
    %c0 = arith.constant 0 : index
    %c0_0 = arith.constant 0 : index
    %c0_1 = arith.constant 0 : index
    %0 = vector.load %arg1[%c0, %c0_0, %c0_1] : memref<8x64x32xbf16, #tpu.memory_space<vmem>>, vector<8x64x32xbf16>
    %1 = arith.extf %0 : vector<8x64x32xbf16> to vector<8x64x32xf32>
    %cst = arith.constant dense<0.000000e+00> : vector<8x32xf32>
    %2 = vector.multi_reduction <add>, %1, %cst [1] : vector<8x64x32xf32> to vector<8x32xf32>
    %cst_2 = arith.constant 1.562500e-02 : f32
    %3 = vector.broadcast %cst_2 : f32 to vector<8x32xf32>
    %4 = arith.mulf %2, %3 : vector<8x32xf32>
    %cst_3 = arith.constant dense<0.000000e+00> : vector<8xf32>
    %5 = vector.multi_reduction <add>, %4, %cst_3 [1] : vector<8x32xf32> to vector<8xf32>
    %6 = vector.shape_cast %5 : vector<8xf32> to vector<8x1xf32>
    %cst_4 = arith.constant 3.200000e+01 : f32
    %7 = vector.broadcast %cst_4 : f32 to vector<8x1xf32>
    %8 = arith.divf %6, %7 : vector<8x1xf32>
    %9 = vector.broadcast %8 : vector<8x1xf32> to vector<8x32xf32>
    %10 = arith.subf %4, %9 : vector<8x32xf32>
    %11 = arith.mulf %10, %10 : vector<8x32xf32>
    %cst_5 = arith.constant dense<0.000000e+00> : vector<8xf32>
    %12 = vector.multi_reduction <add>, %11, %cst_5 [1] : vector<8x32xf32> to vector<8xf32>
    %13 = vector.shape_cast %12 : vector<8xf32> to vector<8x1xf32>
    %cst_6 = arith.constant 3.200000e+01 : f32
    %14 = vector.broadcast %cst_6 : f32 to vector<8x1xf32>
    %15 = arith.divf %13, %14 : vector<8x1xf32>
    %16 = vector.broadcast %8 : vector<8x1xf32> to vector<8x32xf32>
    %17 = arith.subf %4, %16 : vector<8x32xf32>
    %cst_7 = arith.constant 9.99999997E-7 : f32
    %18 = vector.broadcast %cst_7 : f32 to vector<8x1xf32>
    %19 = arith.addf %15, %18 : vector<8x1xf32>
    %20 = math.rsqrt %19 : vector<8x1xf32>
    %21 = vector.broadcast %20 : vector<8x1xf32> to vector<8x32xf32>
    %22 = arith.mulf %17, %21 : vector<8x32xf32>
    %c0_8 = arith.constant 0 : index
    %c0_9 = arith.constant 0 : index
    %23 = vector.load %arg2[%c0_8, %c0_9] : memref<1x32xf32, #tpu.memory_space<vmem>>, vector<1x32xf32>
    %24 = vector.broadcast %23 : vector<1x32xf32> to vector<8x32xf32>
    %25 = arith.mulf %22, %24 : vector<8x32xf32>
    %c0_10 = arith.constant 0 : index
    %c0_11 = arith.constant 0 : index
    %26 = vector.load %arg3[%c0_10, %c0_11] : memref<1x32xf32, #tpu.memory_space<vmem>>, vector<1x32xf32>
    %27 = vector.broadcast %26 : vector<1x32xf32> to vector<8x32xf32>
    %28 = arith.addf %25, %27 : vector<8x32xf32>
    %29 = arith.truncf %28 : vector<8x32xf32> to vector<8x32xbf16>
    %c0_12 = arith.constant 0 : index
    %c0_13 = arith.constant 0 : index
    %30 = vector.load %arg4[%c0_12, %c0_13] : memref<32x128xbf16, #tpu.memory_space<vmem>>, vector<32x128xbf16>
    %cst_14 = arith.constant dense<0.000000e+00> : vector<8x128xf32>
    %31 = tpu.matmul %29, %30, %cst_14 {dimension_numbers = #tpu.dot_dimension_numbers<[1], [0], [0], [1], [0, 0, 1, 1], [], []>} : vector<8x32xbf16>, vector<32x128xbf16>, vector<8x128xf32> -> vector<8x128xf32>
    %c0_15 = arith.constant 0 : index
    %c0_16 = arith.constant 0 : index
    %32 = vector.load %arg5[%c0_15, %c0_16] : memref<1x128xf32, #tpu.memory_space<vmem>>, vector<1x128xf32>
    %33 = vector.broadcast %32 : vector<1x128xf32> to vector<8x128xf32>
    %34 = arith.addf %31, %33 : vector<8x128xf32>
    %c0_17 = arith.constant 0 : index
    %c0_18 = arith.constant 0 : index
    %35 = vector.load %arg6[%c0_17, %c0_18] : memref<8x128xf32, #tpu.memory_space<vmem>>, vector<8x128xf32>
    tpu.vector_store %arg6[%c0_17, %c0_18], %34 {strides = array<i32>} : memref<8x128xf32, #tpu.memory_space<vmem>>, vector<8x128xf32>,
    return
  }
  func.func @transform_0(%arg0: i32) -> (i32, i32, i32) {
    %c0_i32 = arith.constant 0 : i32
    %c0_i32_0 = arith.constant 0 : i32
    %c0_i32_1 = arith.constant 0 : i32
    return %arg0, %c0_i32, %c0_i32_0 : i32, i32, i32
  }
  func.func @transform_1(%arg0: i32) -> (i32, i32) {
    %c0_i32 = arith.constant 0 : i32
    %c0_i32_0 = arith.constant 0 : i32
    %c0_i32_1 = arith.constant 0 : i32
    return %c0_i32, %c0_i32_0 : i32, i32
  }
  func.func @transform_2(%arg0: i32) -> (i32, i32) {
    %c0_i32 = arith.constant 0 : i32
    %c0_i32_0 = arith.constant 0 : i32
    %c0_i32_1 = arith.constant 0 : i32
    return %c0_i32, %c0_i32_0 : i32, i32
  }
  func.func @transform_3(%arg0: i32) -> (i32, i32) {
    %c0_i32 = arith.constant 0 : i32
    %c0_i32_0 = arith.constant 0 : i32
    %c0_i32_1 = arith.constant 0 : i32
    return %c0_i32, %c0_i32_0 : i32, i32
  }
  func.func @transform_4(%arg0: i32) -> (i32, i32) {
    %c0_i32 = arith.constant 0 : i32
    %c0_i32_0 = arith.constant 0 : i32
    %c0_i32_1 = arith.constant 0 : i32
    return %c0_i32, %c0_i32_0 : i32, i32
  }
  func.func @transform_5(%arg0: i32) -> (i32, i32) {
    %c0_i32 = arith.constant 0 : i32
    %c0_i32_0 = arith.constant 0 : i32
    return %arg0, %c0_i32 : i32, i32
  }
}

</mosaic_0001>

<bundles_post_ra>
// kernel: tpu_custom_call.1
= control target key start
LH: loop header
LB: loop body
LE: loop exit
PB: predicated region body
PF: predicated region fallthrough
CT: control target
= control target key end

     0   :  { %10 = vsyncpa [#allocation3], 0  ;;  %s1665_s0 = inlined_call_operand.vmem [shape: bf16[16,64,32], index: 0, kind: input, shape index: {}]   ;;  %s1666_s1 = inlined_call_operand.vmem [shape: f32[1,32], index: 1, kind: input, shape index: {}]   ;;  %s1667_s2 = inlined_call_operand.vmem [shape: f32[1,32], index: 2, kind: input, shape index: {}]   ;;  %s1668_s3 = inlined_call_operand.vmem [shape: bf16[32,128], index: 3, kind: input, shape index: {}]   ;;  %s1669_s4 = inlined_call_operand.vmem [shape: f32[1,128], index: 4, kind: input, shape index: {}]   ;;  %s1670_s5 = inlined_call_operand.hbm [shape: f32[16,128], index: 5, kind: output, shape index: {}]  }
   0x1   :  { %12 = vsyncpa [#allocation3 + $0x1], 0  ;;  %s1187_s18 = smov 0   ;;  %s1189_s19 = smov 0  }
   0x2   :  { %s1191_s20 = smov 0   ;;  %s1193_s21 = smov 0  }
   0x3 LB: > { %s1208_s22 = sadd.s32 4294967295, %s1152_s21   ;;  %s856_s23 = sadd.s32 4294967294, %s1152_s21   ;;  %s1152_s21 = sphi %s1193_s21, %s1706_s21   ;;  %s1148_s20 = sphi %s1191_s20, %s1705_s20   ;;  %s1144_s19 = sphi %s1189_s19, %s1704_s19   ;;  %s1140_s18 = sphi %s1187_s18, %s1703_s18  }
   0x4   : > { %s1212_s24 = sadd.s32 1, %s1152_s21   ;;  %s135_s25 = sadd.s32 1, %s1148_s20 }
   0x5   : > { %s132_s26 = ssub.s32 %s1152_s21, %s1212_s24  ;;  %p145_p0 = scmp.ne.s32.totalorder %s1148_s20, %s1144_s19 }
   0x6   : > { %p133_p1 = scmp.eq.s32.totalorder %s132_s26, 0  ;;  %p146_p2 = scmp.eq.s32.totalorder %s1208_s22, 1 }
   0x7   : > { %p151_p3 = scmp.ne.s32.totalorder %s1144_s19, %s1140_s18  ;;  %p152_p4 = scmp.eq.s32.totalorder %s856_s23, 1 }
   0x8   : > { %s1223_s27 = scalar_select %p133_p1, %s1148_s20, %s135_s25  }
   0x9   : > { %p1225_p5 = por %p146_p2, %p145_p0  ;;  %p1229_p6 = por %p152_p4, %p151_p3 }
   0xa   : > { %p859_p7 = scmp.ge.s32.totalorder %s1152_s21, 1  ;;  %p192_p8 = scmp.lt.s32.totalorder %s1152_s21, 3 }
   0xc   : > { %p193_p9 = pnand %p859_p7, %p192_p8 }
   0xd   : > { %s861_s30 = sshll.u32 (!%p193_p9), %s1208_s22, 3  ;;  %vm357_vm0 = vcmask (!%p193_p9), 261120   ;;  %vm542_vm1 = vcmask (!%p193_p9), 1041409   ;;  %vm544_vm2 = vcmask (!%p193_p9), 1042434   ;;  %vm546_vm3 = vcmask (!%p193_p9), 1043459   ;;  %s218_s23 = sand.u32 (!%p193_p9), 1, %s1144_s19  }
   0xe   : > { %196 = sbr.rel (%p193_p9) target bundleno = 669 (0x29d), region = 40  ;;  %p222_p10 = scmp.lt.s32.totalorder (!%p193_p9), %s861_s30, 15  ;;  %vm548_vm4 = vcmask (!%p193_p9), 1044484   ;;  %vm550_vm5 = vcmask (!%p193_p9), 1045509   ;;  %vm552_vm6 = vcmask (!%p193_p9), 1046534   ;;  %vm554_vm7 = vcmask (!%p193_p9), 1047559  }
   0xf   : > { %vm1155_vm8 = vmmov (!%p193_p9), 0   ;;  %s860_s25 = sshll.u32 (!%p193_p9), %s218_s23, 3  ;;  %s784_s12 = scalar_lea.sflag (!%p193_p9), [#allocation3], %s218_s23 }
  0x10   : > { %s220_s7 = scalar_lea.vmem (!%p193_p9), [#allocation2], %s860_s25  ;;  %s1156_s13 = smov (!%p193_p9), [#allocation2]  }
  0x11   : > { %s797_s8 = sshll.u32 (!%p193_p9), %s220_s7, 4  ;;  %s1094_s14 = sshll.u32 (!%p193_p9), %s1156_s13, 4  ;;  %s1625_s8 = int_to_ptr.vmem [resolvable:$true] %s797_s8  ;;  %s1095_s14 = int_to_ptr.vmem [resolvable:$false] %s1094_s14 }
  0x12   : > { %s1096_s15 = scalar_lea.vmem (!%p193_p9), %s1095_s14, 256  ;;  %p1097_p0 = scmp.lt.s32.totalorder (!%p193_p9), %s1625_s8, %s1095_s14 }
  0x15   : > { %s1708_s30 = smov (!%p222_p10, %s861_s30), 15 }
  0x16   : > { %s874_s6 = sshll.u32 %s1708_s30, 5 }
  0x17   : > { %s1239_s9 = scalar_lea.vmem %s1665_s0, %s874_s6  ;;  %s871_s6 = sshll.u32 %s1208_s22, 7 }
  0x18   : > { %v1242_v0 = vld [vmem:[%s1239_s9] sm:$0xff]   ;;  %v1245_v1 = vld [vmem:[%s1239_s9 + $0x8] sm:$0xff]   ;;  %v1248_v2 = vld [vmem:[%s1239_s9 + $0x10] sm:$0xff]   ;;  %s1623_s11 = scalar_lea.hbm %s1670_s5, %s871_s6  ;;  %s1090_s22 = scalar_lea.vmem %s1625_s8, 128 }
  0x19   : > { %v1251_v3 = vld [vmem:[%s1239_s9 + $0x18] sm:$0xff]   ;;  %v1254_v4 = vld [vmem:[%s1239_s9 + $0x20] sm:$0xff]   ;;  %v1257_v5 = vld [vmem:[%s1239_s9 + $0x28] sm:$0xff]   ;;  %v877_v6 = vunpack.c.l.bf16 %v1242_v0  ;;  %v878_v7 = vunpack.c.h.bf16 %v1242_v0  ;;  %v881_v8 = vunpack.c.l.bf16 %v1245_v1  ;;  %v882_v11 = vunpack.c.h.bf16 %v1245_v1  ;;  %p1091_p11 = scmp.ne.s32.totalorder %s1625_s8, %s1090_s22  ;;  %p1098_p1 = scmp.lt.s32.totalorder %s1096_s15, %s1090_s22 }
  0x1a   : > { %v1263_v9 = vld [vmem:[%s1239_s9 + $0x30] sm:$0xff]   ;;  %v1266_v10 = vld [vmem:[%s1239_s9 + $0x38] sm:$0xff]   ;;  %v885_v12 = vunpack.c.l.bf16 %v1248_v2  ;;  %v886_v13 = vunpack.c.h.bf16 %v1248_v2  ;;  %v889_v14 = vunpack.c.l.bf16 %v1251_v3  ;;  %v1273_v15 = vld [vmem:[%s1239_s9 + $0x40] sm:$0xff]   ;;  %v890_v17 = vunpack.c.h.bf16 %v1251_v3 }
  0x1b   : > { %v1276_v16 = vld [vmem:[%s1239_s9 + $0x48] sm:$0xff]   ;;  %v893_v18 = vunpack.c.l.bf16 %v1254_v4  ;;  %v894_v19 = vunpack.c.h.bf16 %v1254_v4  ;;  %v897_v20 = vunpack.c.l.bf16 %v1257_v5  ;;  %v1283_v21 = vld [vmem:[%s1239_s9 + $0x50] sm:$0xff]   ;;  %v1286_v22 = vld [vmem:[%s1239_s9 + $0x58] sm:$0xff]   ;;  %v898_v23 = vunpack.c.h.bf16 %v1257_v5  ;;  %p1092_p12 = pnand %p1091_p11, %p1225_p5  ;;  %p1099_p2 = por %p1098_p1, %p1097_p0 }
  0x1c   : > { %v901_v24 = vunpack.c.l.bf16 %v1263_v9  ;;  %v902_v25 = vunpack.c.h.bf16 %v1263_v9  ;;  %v905_v26 = vunpack.c.l.bf16 %v1266_v10  ;;  %v1293_v27 = vld [vmem:[%s1239_s9 + $0x60] sm:$0xff]   ;;  %v1296_v28 = vld [vmem:[%s1239_s9 + $0x68] sm:$0xff]   ;;  %v906_v29 = vunpack.c.h.bf16 %v1266_v10  ;;  %v1303_v33 = vld [vmem:[%s1239_s9 + $0x70] sm:$0xff]  }
  0x1d   : > { %v909_v30 = vunpack.c.l.bf16 %v1273_v15  ;;  %v910_v31 = vunpack.c.h.bf16 %v1273_v15  ;;  %v913_v32 = vunpack.c.l.bf16 %v1276_v16  ;;  %v1306_v34 = vld [vmem:[%s1239_s9 + $0x78] sm:$0xff]   ;;  %v914_v35 = vunpack.c.h.bf16 %v1276_v16  ;;  %v1313_v39 = vld [vmem:[%s1239_s9 + $0x80] sm:$0xff]   ;;  %v1316_v40 = vld [vmem:[%s1239_s9 + $0x88] sm:$0xff]   ;;  %p1093_p13 = pneg %p1092_p12 }
  0x1e   : > { %v917_v36 = vunpack.c.l.bf16 %v1283_v21  ;;  %v918_v37 = vunpack.c.h.bf16 %v1283_v21  ;;  %v921_v38 = vunpack.c.l.bf16 %v1286_v22  ;;  %v925_v42 = vunpack.c.l.bf16 %v1293_v27  ;;  %v1323_v45 = vld [vmem:[%s1239_s9 + $0x90] sm:$0xff]   ;;  %v1326_v46 = vld [vmem:[%s1239_s9 + $0x98] sm:$0xff]   ;;  %v1333_v51 = vld [vmem:[%s1239_s9 + $0xa0] sm:$0xff]  }
  0x1f   : > { %v926_v43 = vunpack.c.h.bf16 %v1293_v27  ;;  %v929_v44 = vunpack.c.l.bf16 %v1296_v28  ;;  %v1336_v52 = vld [vmem:[%s1239_s9 + $0xa8] sm:$0xff]   ;;  %v1343_v57 = vld [vmem:[%s1239_s9 + $0xb0] sm:$0xff]   ;;  %v1346_v58 = vld [vmem:[%s1239_s9 + $0xb8] sm:$0xff]   ;;  %v358_v41 = vsel %vm357_vm0, %v877_v6, 0.0  ;;  %v359_v59 = vsel %vm357_vm0, %v878_v7, 0.0  ;;  %p1100_p3 = pnand %p1099_p2, %p1093_p13 }
  0x20   : > { %v1353_v63 = vld [vmem:[%s1239_s9 + $0xc0] sm:$0xff]   ;;  %v1356_v53 = vld [vmem:[%s1239_s9 + $0xc8] sm:$0xff]   ;;  %v1363_v56 = vld [vmem:[%s1239_s9 + $0xd0] sm:$0xff]   ;;  %v361_v62 = vsel %vm357_vm0, %v881_v8, 0.0  ;;  %v360_v49 = vadd.f32 %v359_v59, %v358_v41  ;;  %v363_v50 = vsel %vm357_vm0, %v882_v11, 0.0  ;;  %v379_v0 = vsel %vm357_vm0, %v893_v18, 0.0 }
  0x21   : > { %v1366_v60 = vld [vmem:[%s1239_s9 + $0xd8] sm:$0xff]   ;;  %v1377_v48 = vld [vmem:[%s1239_s9 + $0xe0] sm:$0xff]   ;;  %v1380_v47 = vld [vmem:[%s1239_s9 + $0xe8] sm:$0xff]   ;;  %v380_v6 = vsel %vm357_vm0, %v894_v19, 0.0  ;;  %v382_v7 = vsel %vm357_vm0, %v897_v20, 0.0  ;;  %v365_v41 = vsel %vm357_vm0, %v885_v12, 0.0  ;;  %v1675_v21 = vunpack.c.l.bf16 %v1313_v39 }
  0x22   : > { %v989_v61 = vunpack.c.l.bf16 %v1377_v48  ;;  %v990_v55 = vunpack.c.h.bf16 %v1377_v48  ;;  %v993_v54 = vunpack.c.l.bf16 %v1380_v47  ;;  %v362_v8 = vadd.f32 %v361_v62, %v360_v49 }
  0x23   : > { %v367_v1 = vsel %vm357_vm0, %v886_v13, 0.0  ;;  %v381_v11 = vadd.f32 %v380_v6, %v379_v0  ;;  %v369_v4 = vsel %vm357_vm0, %v889_v14, 0.0  ;;  %v371_v18 = vsel %vm357_vm0, %v890_v17, 0.0 }
  0x24   : > { %v384_v19 = vsel %vm357_vm0, %v898_v23, 0.0  ;;  %v400_v12 = vsel %vm357_vm0, %v909_v30, 0.0  ;;  %v364_v2 = vadd.f32 %v363_v50, %v362_v8  ;;  %v401_v13 = vsel %vm357_vm0, %v910_v31, 0.0 }
  0x25   : > { %v383_v20 = vadd.f32 %v382_v7, %v381_v11  ;;  %v403_v3 = vsel %vm357_vm0, %v913_v32, 0.0  ;;  %v386_v5 = vsel %vm357_vm0, %v901_v24, 0.0  ;;  %v388_v14 = vsel %vm357_vm0, %v902_v25, 0.0 }
  0x26   : > { %v390_v17 = vsel %vm357_vm0, %v905_v26, 0.0  ;;  %v402_v23 = vadd.f32 %v401_v13, %v400_v12  ;;  %v366_v15 = vadd.f32 %v365_v41, %v364_v2  ;;  %v392_v31 = vsel %vm357_vm0, %v906_v29, 0.0 }
  0x27   : > { %v385_v30 = vadd.f32 %v384_v19, %v383_v20  ;;  %v405_v32 = vsel %vm357_vm0, %v914_v35, 0.0  ;;  %v421_v9 = vsel %vm357_vm0, %v925_v42, 0.0  ;;  %v422_v25 = vsel %vm357_vm0, %v926_v43, 0.0 }
  0x28   : > { %v404_v24 = vadd.f32 %v403_v3, %v402_v23  ;;  %v424_v26 = vsel %vm357_vm0, %v929_v44, 0.0  ;;  %v368_v10 = vadd.f32 %v367_v1, %v366_v15  ;;  %v407_v16 = vsel %vm357_vm0, %v917_v36, 0.0 }
  0x29   : > { %v387_v49 = vadd.f32 %v386_v5, %v385_v30  ;;  %v423_v29 = vadd.f32 %v422_v25, %v421_v9  ;;  %v409_v42 = vsel %vm357_vm0, %v918_v37, 0.0  ;;  %v411_v27 = vsel %vm357_vm0, %v921_v38, 0.0 }
  0x2a   : > { %v406_v35 = vadd.f32 %v405_v32, %v404_v24  ;;  %v1673_v43 = vunpack.c.h.bf16 %v1296_v28  ;;  %v370_v50 = vadd.f32 %v369_v4, %v368_v10  ;;  %v1674_v0 = vunpack.c.l.bf16 %v1303_v33 }
  0x2b   : > { %v389_v59 = vadd.f32 %v388_v14, %v387_v49  ;;  %v425_v62 = vadd.f32 %v424_v26, %v423_v29  ;;  %v442_v37 = vsel %vm357_vm0, %v1675_v21, 0.0  ;;  %v1676_v7 = vunpack.c.h.bf16 %v1313_v39 }
  0x2c   : > { %v426_v44 = vsel %vm357_vm0, %v1673_v43, 0.0  ;;  %v428_v36 = vsel %vm357_vm0, %v1674_v0, 0.0  ;;  %v408_v6 = vadd.f32 %v407_v16, %v406_v35  ;;  %v1677_v28 = vunpack.c.l.bf16 %v1316_v40 }
  0x2d   : > { %v443_v38 = vsel %vm357_vm0, %v1676_v7, 0.0  ;;  %v372_v41 = vadd.f32 %v371_v18, %v370_v50  ;;  %v391_v1 = vadd.f32 %v390_v17, %v389_v59  ;;  %v427_v11 = vadd.f32 %v426_v44, %v425_v62 }
  0x2e   : > { %v445_v8 = vsel %vm357_vm0, %v1677_v28, 0.0  ;;  %v444_v4 = vadd.f32 %v443_v38, %v442_v37  ;;  %v410_v19 = vadd.f32 %v409_v42, %v408_v6  ;;  %v1678_v12 = vunpack.c.h.bf16 %v1286_v22 }
  0x2f   : > { %v1679_v20 = vunpack.c.h.bf16 %v1303_v33  ;;  %v1680_v39 = vunpack.c.h.bf16 %v1316_v40  ;;  %v373_v5 = vrot.slane %v372_v41, 4  ;;  %v393_v14 = vadd.f32 %v392_v31, %v391_v1 }
  0x30   : > { %v413_v2 = vsel %vm357_vm0, %v1678_v12, 0.0  ;;  %v429_v23 = vadd.f32 %v428_v36, %v427_v11  ;;  %v446_v18 = vadd.f32 %v445_v8, %v444_v4  ;;  %v412_v17 = vadd.f32 %v411_v27, %v410_v19 }
  0x31   : > { %v430_v13 = vsel %vm357_vm0, %v1679_v20, 0.0  ;;  %v447_v3 = vsel %vm357_vm0, %v1680_v39, 0.0  ;;  %v1681_v15 = vunpack.c.l.bf16 %v1306_v34  ;;  %v1682_v22 = vunpack.c.l.bf16 %v1323_v45 }
  0x32   : > { %v1683_v32 = vunpack.c.l.bf16 %v1333_v51  ;;  %v374_v24 = vadd.f32 %v373_v5, %v372_v41  ;;  %v394_v9 = vrot.slane %v393_v14, 4  ;;  %v431_v25 = vadd.f32 %v430_v13, %v429_v23 }
  0x33   : > { %v432_v30 = vsel %vm357_vm0, %v1681_v15, 0.0  ;;  %v449_v33 = vsel %vm357_vm0, %v1682_v22, 0.0  ;;  %v448_v31 = vadd.f32 %v447_v3, %v446_v18  ;;  %v414_v26 = vadd.f32 %v413_v2, %v412_v17 }
  0x34   : > { %v463_v40 = vsel %vm357_vm0, %v1683_v32, 0.0  ;;  %v1684_v10 = vunpack.c.h.bf16 %v1306_v34  ;;  %v1685_v16 = vunpack.c.h.bf16 %v1323_v45  ;;  %v1686_v35 = vunpack.c.h.bf16 %v1333_v51  ;;  %v1515_v34 = vld [vmem:[%s1239_s9 + $0xf0] sm:$0xff]  }
  0x35   : > { %v395_v27 = vadd.f32 %v394_v9, %v393_v14  ;;  %v433_v43 = vadd.f32 %v432_v30, %v431_v25  ;;  %v450_v44 = vadd.f32 %v449_v33, %v448_v31  ;;  %v1687_v50 = vunpack.c.l.bf16 %v1336_v52 }
  0x36   : > { %v434_v49 = vsel %vm357_vm0, %v1684_v10, 0.0  ;;  %v451_v29 = vsel %vm357_vm0, %v1685_v16, 0.0  ;;  %v464_v42 = vsel %vm357_vm0, %v1686_v35, 0.0  ;;  %v994_v62 = vunpack.c.h.bf16 %v1380_v47 }
  0x37   : > { %v466_v59 = vsel %vm357_vm0, %v1687_v50, 0.0  ;;  %v415_v0 = vrot.slane %v414_v26, 4  ;;  %v1688_v45 = vunpack.c.l.bf16 %v1326_v46  ;;  %v465_v6 = vadd.f32 %v464_v42, %v463_v40 }
  0x38   : > { %v375_v51 = vrot.slane %v374_v24, 2  ;;  %v435_v21 = vadd.f32 %v434_v49, %v433_v43  ;;  %v452_v37 = vadd.f32 %v451_v29, %v450_v44  ;;  %v1689_v7 = vunpack.c.h.bf16 %v1336_v52 }
  0x39   : > { %v453_v36 = vsel %vm357_vm0, %v1688_v45, 0.0  ;;  %v396_v28 = vrot.slane %v395_v27, 2  ;;  %v416_v8 = vadd.f32 %v415_v0, %v414_v26  ;;  %v1690_v41 = vunpack.c.h.bf16 %v1326_v46 }
  0x3a   : > { %v468_v38 = vsel %vm357_vm0, %v1689_v7, 0.0  ;;  %v467_v11 = vadd.f32 %v466_v59, %v465_v6  ;;  %v997_v4 = vunpack.c.l.bf16 %v1515_v34  ;;  %v436_v19 = vrot.slane %v435_v21, 4 }
  0x3b   : > { %v455_v1 = vsel %vm357_vm0, %v1690_v41, 0.0  ;;  %v454_v12 = vadd.f32 %v453_v36, %v452_v37  ;;  %v1691_v2 = vunpack.c.l.bf16 %v1343_v57  ;;  %v1692_v52 = vunpack.c.h.bf16 %v1343_v57 }
  0x3c   : > { %v469_v13 = vadd.f32 %v468_v38, %v467_v11  ;;  %v1693_v3 = vunpack.c.l.bf16 %v1353_v63  ;;  %v1694_v5 = vunpack.c.h.bf16 %v1353_v63  ;;  %v376_v23 = vadd.f32 %v375_v51, %v374_v24  ;;  %v1033_v51 = vld [vmem:[%s1239_s9 + $0xf8] sm:$0xff]  }
  0x3d   : > { %v470_v20 = vsel %vm357_vm0, %v1691_v2, 0.0  ;;  %v472_v39 = vsel %vm357_vm0, %v1692_v52, 0.0  ;;  %v417_v18 = vrot.slane %v416_v8, 2  ;;  %v437_v17 = vadd.f32 %v436_v19, %v435_v21 }
  0x3e   : > { %v484_v46 = vsel %vm357_vm0, %v1693_v3, 0.0  ;;  %v485_v14 = vsel %vm357_vm0, %v1694_v5, 0.0  ;;  %v456_v15 = vadd.f32 %v455_v1, %v454_v12  ;;  %v397_v30 = vadd.f32 %v396_v28, %v395_v27 }
  0x3f   : > { %v471_v22 = vadd.f32 %v470_v20, %v469_v13  ;;  %v486_v33 = vadd.f32 %v485_v14, %v484_v46  ;;  %v1695_v32 = vunpack.c.l.bf16 %v1356_v53  ;;  %v438_v40 = vrot.slane %v437_v17, 2 }
  0x40   : > { %v457_v9 = vrot.slane %v456_v15, 4  ;;  %v1696_v25 = vunpack.c.l.bf16 %v1346_v58  ;;  %v1697_v63 = vunpack.c.h.bf16 %v1356_v53  ;;  %v998_v26 = vunpack.c.h.bf16 %v1515_v34 }
  0x41   : > { %v487_v57 = vsel %vm357_vm0, %v1695_v32, 0.0  ;;  %v473_v10 = vadd.f32 %v472_v39, %v471_v22  ;;  %v1698_v49 = vunpack.c.h.bf16 %v1346_v58  ;;  %v377_v35 = vrot.slane %v376_v23, 1 }
  0x42   : > { %v474_v31 = vsel %vm357_vm0, %v1696_v25, 0.0  ;;  %v489_v24 = vsel %vm357_vm0, %v1697_v63, 0.0  ;;  %v488_v29 = vadd.f32 %v487_v57, %v486_v33  ;;  %v418_v42 = vadd.f32 %v417_v18, %v416_v8 }
  0x43   : > { %v476_v16 = vsel %vm357_vm0, %v1698_v49, 0.0  ;;  %v458_v27 = vadd.f32 %v457_v9, %v456_v15  ;;  %v1699_v43 = vunpack.c.l.bf16 %v1363_v56  ;;  %v398_v50 = vrot.slane %v397_v30, 1 }
  0x44   : > { %v439_v53 = vadd.f32 %v438_v40, %v437_v17  ;;  %v475_v59 = vadd.f32 %v474_v31, %v473_v10  ;;  %v490_v0 = vadd.f32 %v489_v24, %v488_v29  ;;  %v1700_v34 = vunpack.c.h.bf16 %v1363_v56 }
  0x45   : > { %v491_v44 = vsel %vm357_vm0, %v1699_v43, 0.0  ;;  %v459_v45 = vrot.slane %v458_v27, 2  ;;  %v505_v58 = vsel %vm357_vm0, %v989_v61, 0.0  ;;  %v506_v6 = vsel %vm357_vm0, %v990_v55, 0.0 }
  0x46   : > { %v493_v36 = vsel %vm357_vm0, %v1700_v34, 0.0  ;;  %v477_v21 = vadd.f32 %v476_v16, %v475_v59  ;;  %v492_v37 = vadd.f32 %v491_v44, %v490_v0  ;;  %v507_v7 = vadd.f32 %v506_v6, %v505_v58 }
  0x47   : > { %v508_v38 = vsel %vm357_vm0, %v993_v54, 0.0  ;;  %v378_v28 = vadd.f32 %v377_v35, %v376_v23  ;;  %v419_v56 = vrot.slane %v418_v42, 1  ;;  %v1701_v8 = vunpack.c.l.bf16 %v1366_v60 }
  0x48   : > { %v510_v61 = vsel %vm357_vm0, %v994_v62, 0.0  ;;  %v399_v1 = vadd.f32 %v398_v50, %v397_v30  ;;  %v478_v48 = vrot.slane %v477_v21, 4  ;;  %v494_v11 = vadd.f32 %v493_v36, %v492_v37 }
  0x49   : > { %v495_v41 = vsel %vm357_vm0, %v1701_v8, 0.0  ;;  %v509_v55 = vadd.f32 %v508_v38, %v507_v7  ;;  %v1001_v19 = vunpack.c.l.bf16 %v1033_v51  ;;  %v460_v12 = vadd.f32 %v459_v45, %v458_v27 }
  0x4a   : > { %v1702_v2 = vunpack.c.h.bf16 %v1366_v60  ;;  %v512_v54 = vsel %vm357_vm0, %v997_v4, 0.0  ;;  %v440_v20 = vrot.slane %v439_v53, 1  ;;  %v479_v13 = vadd.f32 %v478_v48, %v477_v21 }
  0x4b   : > { %v496_v52 = vadd.f32 %v495_v41, %v494_v11  ;;  %v511_v39 = vadd.f32 %v510_v61, %v509_v55  ;;  %v1002_v3 = vunpack.c.h.bf16 %v1033_v51  ;;  %v420_v46 = vadd.f32 %v419_v56, %v418_v42 }
  0x4c   : > { %v497_v47 = vsel %vm357_vm0, %v1702_v2, 0.0  ;;  %v514_v62 = vsel %vm357_vm0, %v998_v26, 0.0  ;;  %v526_v5 = vmul.f32 0.015625, %v378_v28  ;;  %v480_v14 = vrot.slane %v479_v13, 2 }
  0x4d   : > { %v498_v23 = vadd.f32 %v497_v47, %v496_v52  ;;  %v513_v18 = vadd.f32 %v512_v54, %v511_v39  ;;  %v527_v17 = vmul.f32 0.015625, %v399_v1  ;;  %v461_v15 = vrot.slane %v460_v12, 1 }
  0x4e   : > { %v516_v60 = vsel %vm357_vm0, %v1001_v19, 0.0  ;;  %v441_v30 = vadd.f32 %v440_v20, %v439_v53  ;;  %v481_v22 = vadd.f32 %v480_v14, %v479_v13  ;;  %v518_v32 = vsel %vm357_vm0, %v1002_v3, 0.0 }
  0x4f   : > { %v499_v4 = vrot.slane %v498_v23, 4  ;;  %v515_v33 = vadd.f32 %v514_v62, %v513_v18  ;;  %v528_v57 = vmul.f32 0.015625, %v420_v46  ;;  %v543_v31 = vsel %vm542_vm1, %v527_v17, %v526_v5 }
  0x50   : > { %v482_v40 = vrot.slane %v481_v22, 1  ;;  %v462_v63 = vadd.f32 %v461_v15, %v460_v12  ;;  %v529_v10 = vmul.f32 0.015625, %v441_v30 }
  0x51   : > { %v500_v9 = vadd.f32 %v499_v4, %v498_v23  ;;  %v517_v25 = vadd.f32 %v516_v60, %v515_v33  ;;  %v545_v49 = vsel %vm544_vm2, %v528_v57, %v543_v31 }
  0x52   : > { %v483_v16 = vadd.f32 %v482_v40, %v481_v22  ;;  %v530_v42 = vmul.f32 0.015625, %v462_v63  ;;  %v547_v44 = vsel %vm546_vm3, %v529_v10, %v545_v49 }
  0x53   : > { %v501_v24 = vrot.slane %v500_v9, 2  ;;  %v519_v26 = vadd.f32 %v518_v32, %v517_v25 }
  0x54   : > { %v531_v59 = vmul.f32 0.015625, %v483_v16  ;;  %v549_v0 = vsel %vm548_vm4, %v530_v42, %v547_v44 }
  0x55   : > { %v502_v29 = vadd.f32 %v501_v24, %v500_v9  ;;  %v520_v35 = vrot.slane %v519_v26, 4  ;;  %v1086_v24 = vld [vmem:[%s1668_s3] sm:$0xff]  }
  0x56   : > { %v551_v58 = vsel %vm550_vm5, %v531_v59, %v549_v0 }
  0x57   : > { %v503_v27 = vrot.slane %v502_v29, 1  ;;  %v521_v43 = vadd.f32 %v520_v35, %v519_v26  ;;  %v1154_v26 = vmov 0.0  }
  0x58   : > { %1037 = vmatprep.subr.bf16.mxu0 %v1154_v26  ;;  %1041 = vmatprep.mubr.msk.bf16.mxu0 %vm1155_vm8, %v1154_v26 }
  0x59   : > { %v504_v50 = vadd.f32 %v503_v27, %v502_v29  ;;  %v522_v53 = vrot.slane %v521_v43, 2  ;;  %1038 = vmatpush3.bf16.msra.mxu0 %v1086_v24 }
  0x5a   : > { %1039 = vmatprep.subr.bf16.mxu0 %v1154_v26 }
  0x5b   : > { %v523_v45 = vadd.f32 %v522_v53, %v521_v43  ;;  %v532_v34 = vmul.f32 0.015625, %v504_v50  ;;  %v864_v50 = vld [vmem:[%s1666_s1] ss:$0 sm:$0xff] }
  0x5d   : > { %v524_v36 = vrot.slane %v523_v45, 1  ;;  %v553_v51 = vsel %vm552_vm6, %v532_v34, %v551_v58 }
  0x5f   : > { %v525_v6 = vadd.f32 %v524_v36, %v523_v45 }
  0x61   : > { %v533_v21 = vmul.f32 0.015625, %v525_v6 }
  0x63   : > { %v555_v37 = vsel %vm554_vm7, %v533_v21, %v553_v51  ;;  %v865_v51 = vld [vmem:[%s1667_s2] ss:$0 sm:$0xff] }
  0x64   : > { %v557_v7 = vsel %vm357_vm0, %v555_v37, 0.0 }
  0x65   : > { %558 = vadd.xlane.f32.xlu0 %v557_v7 }
  0xf2   : > { %v559_v38 = vpop.xlane.xlu0 %558 }
  0xf3   : > { %v561_v28 = vmul.f32 0.03125, %v559_v38 }
  0xf5   : > { %v563_v56 = vrot.slane %v561_v28, 1  ;;  %v564_v8 = vrot.slane %v561_v28, 2  ;;  %v565_v41 = vrot.slane %v561_v28, 3  ;;  %v566_v61 = vrot.slane %v561_v28, 4 }
  0xf6   : > { %v567_v1 = vrot.slane %v561_v28, 5  ;;  %v568_v48 = vrot.slane %v561_v28, 6  ;;  %v569_v11 = vrot.slane %v561_v28, 7  ;;  %v578_v55 = vsub.f32 %v526_v5, %v561_v28 }
  0xf7   : > { %v579_v19 = vsub.f32 %v527_v17, %v563_v56  ;;  %v580_v12 = vsub.f32 %v528_v57, %v564_v8  ;;  %v581_v2 = vsub.f32 %v529_v10, %v565_v41  ;;  %v582_v47 = vsub.f32 %v530_v42, %v566_v61  ;;  %v1087_v10 = vld [vmem:[%s1668_s3 + $0x8] sm:$0xff]  }
  0xf8   : > { %v583_v54 = vsub.f32 %v531_v59, %v567_v1  ;;  %v584_v20 = vsub.f32 %v532_v34, %v568_v48  ;;  %v585_v13 = vsub.f32 %v533_v21, %v569_v11  ;;  %v586_v62 = vmul.f32 %v578_v55, %v578_v55  ;;  %1040 = vmatpush3.bf16.msra.mxu0 %v1087_v10 }
  0xf9   : > { %v587_v52 = vmul.f32 %v579_v19, %v579_v19  ;;  %v588_v39 = vmul.f32 %v580_v12, %v580_v12  ;;  %v589_v3 = vmul.f32 %v581_v2, %v581_v2  ;;  %v590_v46 = vmul.f32 %v582_v47, %v582_v47 }
  0xfa   : > { %v591_v14 = vmul.f32 %v583_v54, %v583_v54  ;;  %v592_v15 = vmul.f32 %v584_v20, %v584_v20  ;;  %v593_v60 = vmul.f32 %v585_v13, %v585_v13 }
  0xfb   : > { %v602_v23 = vrot.slane %v587_v52, 7  ;;  %v604_v18 = vrot.slane %v588_v39, 6  ;;  %v606_v5 = vrot.slane %v589_v3, 5  ;;  %v608_v22 = vrot.slane %v590_v46, 4 }
  0xfc   : > { %v610_v33 = vrot.slane %v591_v14, 3  ;;  %v612_v57 = vrot.slane %v592_v15, 2  ;;  %v614_v9 = vrot.slane %v593_v60, 1 }
  0xfd   : > { %v603_v30 = vsel %vm542_vm1, %v602_v23, %v586_v62 }
  0xfe   : > { %v605_v17 = vsel %vm544_vm2, %v604_v18, %v603_v30 }
  0xff   : > { %v607_v4 = vsel %vm546_vm3, %v606_v5, %v605_v17 }
 0x100   : > { %v609_v32 = vsel %vm548_vm4, %v608_v22, %v607_v4 }
 0x101   : > { %v611_v40 = vsel %vm550_vm5, %v610_v33, %v609_v32 }
 0x102   : > { %v613_v25 = vsel %vm552_vm6, %v612_v57, %v611_v40 }
 0x103   : > { %v615_v31 = vsel %vm554_vm7, %v614_v9, %v613_v25 }
 0x104   : > { %v617_v63 = vsel %vm357_vm0, %v615_v31, 0.0 }
 0x105   : > { %618 = vadd.xlane.f32.xlu0 %v617_v63 }
 0x192   : > { %v619_v49 = vpop.xlane.xlu0 %618 }
 0x193   : > { %v620_v16 = vmul.f32 0.03125, %v619_v49 }
 0x195   : > { %v621_v29 = vadd.f32 1e-06, %v620_v16 }
 0x197   : > { %1088 = vrsqrt.f32 %v621_v29 }
 0x1a1   : > { %v1089_v35 = vpop.eup %1088 }
 0x1a2   : > { %v624_v42 = vrot.slane %v1089_v35, 1  ;;  %v625_v27 = vrot.slane %v1089_v35, 2  ;;  %v626_v43 = vrot.slane %v1089_v35, 3  ;;  %v627_v44 = vrot.slane %v1089_v35, 4 }
 0x1a3   : > { %v628_v53 = vrot.slane %v1089_v35, 5  ;;  %v629_v59 = vrot.slane %v1089_v35, 6  ;;  %v630_v0 = vrot.slane %v1089_v35, 7  ;;  %v639_v45 = vmul.f32 %v1089_v35, %v578_v55 }
 0x1a4   : > { %v640_v34 = vmul.f32 %v624_v42, %v579_v19  ;;  %v641_v36 = vmul.f32 %v625_v27, %v580_v12  ;;  %v642_v58 = vmul.f32 %v626_v43, %v581_v2  ;;  %v643_v6 = vmul.f32 %v627_v44, %v582_v47  ;;  %v866_v42 = vld [vmem:[%s1669_s4] ss:$0 sm:$0xff] }
 0x1a5   : > { %v644_v21 = vmul.f32 %v628_v53, %v583_v54  ;;  %v645_v37 = vmul.f32 %v629_v59, %v584_v20  ;;  %v646_v7 = vmul.f32 %v630_v0, %v585_v13  ;;  %v654_v38 = vmul.f32 %v864_v50, %v639_v45 }
 0x1a6   : > { %v655_v28 = vmul.f32 %v864_v50, %v640_v34  ;;  %v656_v56 = vmul.f32 %v864_v50, %v641_v36  ;;  %v657_v8 = vmul.f32 %v864_v50, %v642_v58  ;;  %v658_v41 = vmul.f32 %v864_v50, %v643_v6 }
 0x1a7   : > { %v659_v61 = vmul.f32 %v864_v50, %v644_v21  ;;  %v660_v1 = vmul.f32 %v864_v50, %v645_v37  ;;  %v661_v48 = vmul.f32 %v864_v50, %v646_v7  ;;  %v669_v11 = vadd.f32 %v865_v51, %v654_v38 }
 0x1a8   : > { %v670_v55 = vadd.f32 %v865_v51, %v655_v28  ;;  %v671_v19 = vadd.f32 %v865_v51, %v656_v56  ;;  %v672_v12 = vadd.f32 %v865_v51, %v657_v8  ;;  %v673_v2 = vadd.f32 %v865_v51, %v658_v41 }
 0x1a9   : > { %v674_v47 = vadd.f32 %v865_v51, %v659_v61  ;;  %v675_v52 = vadd.f32 %v865_v51, %v660_v1  ;;  %v676_v39 = vadd.f32 %v865_v51, %v661_v48  ;;  %v677_v3 = vpack.c.bf16 %v669_v11, %v669_v11 }
 0x1aa   : > { %v678_v54 = vpack.c.bf16 %v670_v55, %v670_v55  ;;  %v679_v20 = vpack.c.bf16 %v671_v19, %v671_v19  ;;  %v680_v13 = vpack.c.bf16 %v672_v12, %v672_v12  ;;  %v681_v46 = vpack.c.bf16 %v673_v2, %v673_v2 }
 0x1ab   : > { %v682_v62 = vpack.c.bf16 %v674_v47, %v674_v47  ;;  %v683_v14 = vpack.c.bf16 %v675_v52, %v675_v52  ;;  %v684_v23 = vpack.c.bf16 %v676_v39, %v676_v39  ;;  %v704_v5 = vunpack.c.l.b16 %v677_v3 }
 0x1ac   : > { %v705_v18 = vunpack.c.l.b16 %v678_v54  ;;  %v706_v15 = vunpack.c.l.b16 %v679_v20  ;;  %v707_v60 = vunpack.c.l.b16 %v680_v13  ;;  %v708_v30 = vunpack.c.l.b16 %v681_v46 }
 0x1ad   : > { %v709_v17 = vunpack.c.l.b16 %v682_v62  ;;  %v710_v33 = vunpack.c.l.b16 %v683_v14  ;;  %v711_v32 = vunpack.c.l.b16 %v684_v23 }
 0x1ae   : > { %v712_v22 = vrot.slane %v705_v18, 7  ;;  %v714_v4 = vrot.slane %v706_v15, 6  ;;  %v716_v40 = vrot.slane %v707_v60, 5  ;;  %v718_v25 = vrot.slane %v708_v30, 4 }
 0x1af   : > { %v720_v63 = vrot.slane %v709_v17, 3  ;;  %v722_v26 = vrot.slane %v710_v33, 2  ;;  %v724_v49 = vrot.slane %v711_v32, 1 }
 0x1b0   : > { %v713_v57 = vsel %vm542_vm1, %v712_v22, %v704_v5 }
 0x1b1   : > { %v715_v9 = vsel %vm544_vm2, %v714_v4, %v713_v57 }
 0x1b2   : > { %v717_v31 = vsel %vm546_vm3, %v716_v40, %v715_v9 }
 0x1b3   : > { %v719_v24 = vsel %vm548_vm4, %v718_v25, %v717_v31 }
 0x1b4   : > { %v721_v10 = vsel %vm550_vm5, %v720_v63, %v719_v24 }
 0x1b5   : > { %v723_v16 = vsel %vm552_vm6, %v722_v26, %v721_v10 }
 0x1b6   : > { %v725_v29 = vsel %vm554_vm7, %v724_v49, %v723_v16 }
 0x1b7   : > { %v726_v35 = vpack.c.b16 %v725_v29, %v725_v29 }
 0x1b9   : > { %1042 = vmatmul.mubr.msk.bf16.vlgmr.msra.gmra.mrb[0].mxu0 %vm357_vm0, %v726_v35 }
 0x28c   : > { %v776_v27 = vpop.f32.mrb[0].mxu0 }
 0x28d   : > { %v777_v43 = vadd.f32 %v866_v42, %v776_v27  ;;  %v1043_v44 = vpop.f32.mrb[1].mxu0 }
 0x28e   : > { %v779_v50 = vpop.f32.mrb[2].mxu0 }
 0x28f   : > { %782 = vst [vmem:[%s220_s7] sm:$0xff] %v777_v43  ;;  %v1044_v53 = vpop.f32.mrb[3].mxu0 }
 0x290   : > { %1103 = shalt.err (!%p1100_p3)
}
 0x291   : > { %s1104_s16 = scalar_lea.hbm %s1623_s11, 128  ;;  %s1108_s25 = scalar_lea.hbm %s1670_s5, 256 }
 0x292   : > { %p1105_p4 = scmp.ne.s32.totalorder %s1623_s11, %s1104_s16  ;;  %p1109_p9 = scmp.lt.u32.totalorder %s1623_s11, %s1670_s5 }
 0x293   : > { %p1110_p10 = scmp.lt.u32.totalorder %s1108_s25, %s1104_s16  ;;  %p1112_p12 = scmp.lt.u32.totalorder %s1104_s16, %s1623_s11 }
 0x294   : > { %p1106_p7 = pnand %p1105_p4, %p1225_p5 }
 0x295   : > { %p1111_p11 = por %p1110_p10, %p1109_p9 }
 0x296   : > { %p1107_p8 = pneg %p1106_p7 }
 0x297   : > { %p1113_p13 = por %p1112_p12, %p1111_p11 }
 0x299   : > { %p1114_p0 = pnand %p1113_p13, %p1107_p8 }
 0x29b   : > { %1117 = shalt.err (!%p1114_p0)
}
 0x29c   : > { %1045 = dma.vmem_to_hbm [thread:$0]  (%p1225_p5), %s1625_s8, 128, %s1623_s11, %s784_s12  }
 0x29d PF: > { %p1051_p1 = scmp.ge.s32.totalorder %s1152_s21, 2  ;;  %s809_s6 = sand.u32 1, %s1140_s18  }
 0x29e   : > { %s810_s7 = scalar_lea.sflag [#allocation3], %s809_s6 }
 0x29f   : > { %p1048_p2 = pnand %p1051_p1, %p1229_p6 }
 0x2a1   : > { %1135 = dma.done.wait (!%p1048_p2), %s810_s7, 128  }
 0x2a2   : > { %1137 = vsyncadd (!%p1048_p2), %s810_s7, 4294967168  ;;  %p15_p3 = scmp.ge.s32.totalorder %s1212_s24, 4   ;;  %s1703_s18 = smov %s1144_s19 }
 0x2a3   : > { %s1704_s19 = smov %s1148_s20  ;;  %s1705_s20 = smov %s1223_s27 }
 0x2a4   : > { %s1706_s21 = smov %s1212_s24  ;;  %17 = sbr.rel (!%p15_p3) target bundleno = 3 (0x3), region = 75 }
 0x2ab   :  { %815 = vsyncpa [#allocation3], 1 }
 0x2ac   :  { %817 = vsyncpa [#allocation3 + $0x1], 1 }

</bundles_post_ra>
